<compile_context>
chip_gen: v5e
topology: v5e:2x2
jax: 0.10.0
libtpu: 0.0.40
codegen_flags: <defaults>
</compile_context>

<pallas_src>
import functools

import jax
import jax.numpy as jnp
from jax.experimental import pallas as pl
from jax.experimental.pallas import tpu as pltpu

_LANE = 128


def _mlp_kernel(x_ref, w1_ref, b1_ref, w2_ref, b2_ref, o_ref):
    # Layer 1: [tb, D]bf16 @ [D, H]bf16 -> f32 accumulate; bias + ReLU in f32.
    h = jnp.dot(x_ref[...], w1_ref[...], preferred_element_type=jnp.float32)
    h = jnp.maximum(h + b1_ref[...], 0.0)
    # Layer 2: cast hidden to bf16 so the MXU stays on its bf16 path.
    o = jnp.dot(h.astype(w2_ref.dtype), w2_ref[...],
                preferred_element_type=jnp.float32)
    o_ref[...] = (o + b2_ref[...]).astype(o_ref.dtype)


def prepare_params(w1, b1, w2, b2):
    """One-time parameter prep: transpose to [in, out], pad the output dim to a
    multiple of 128 lanes, and cast matmul operands to bfloat16.

    w1: [latent_dim, input_dim]   (PyTorch nn.Linear layout)
    b1: [latent_dim]
    w2: [num_domains, latent_dim]
    b2: [num_domains]
    """
    latent_dim, _ = w1.shape
    num_domains = w2.shape[0]
    c_pad = pl.cdiv(num_domains, _LANE) * _LANE

    w1_t = jnp.asarray(w1.T, dtype=jnp.bfloat16)                     # [D, H]
    b1_2d = jnp.asarray(b1, jnp.float32).reshape(1, latent_dim)      # [1, H]

    w2_t = jnp.zeros((latent_dim, c_pad), jnp.bfloat16)
    w2_t = w2_t.at[:, :num_domains].set(w2.T.astype(jnp.bfloat16))   # [H, Cp]
    b2_2d = jnp.zeros((1, c_pad), jnp.float32)
    b2_2d = b2_2d.at[:, :num_domains].set(jnp.asarray(b2, jnp.float32))

    return w1_t, b1_2d, w2_t, b2_2d


@functools.partial(jax.jit, static_argnames=("num_domains", "block_b"))
def domain_predictor_forward(x, w1_t, b1_2d, w2_t, b2_2d, *,
                             num_domains, block_b=128):
    """Forward pass. x: [B, input_dim] f32 -> [B, num_domains] f32."""
    B, input_dim = x.shape
    latent_dim = w1_t.shape[1]
    c_pad = w2_t.shape[1]

    # Pad the batch so every grid step sees a full [block_b, D] tile.
    n_blocks = pl.cdiv(B, block_b)
    b_pad = n_blocks * block_b
    x_b = x.astype(jnp.bfloat16)
    if b_pad != B:
        x_b = jnp.pad(x_b, ((0, b_pad - B), (0, 0)))

    out = pl.pallas_call(
        _mlp_kernel,
        out_shape=jax.ShapeDtypeStruct((b_pad, c_pad), jnp.float32),
        grid_spec=pltpu.PrefetchScalarGridSpec(
            num_scalar_prefetch=0,
            grid=(n_blocks,),
            in_specs=[
                pl.BlockSpec((block_b, input_dim), lambda i: (i, 0)),
                pl.BlockSpec((input_dim, latent_dim), lambda i: (0, 0)),
                pl.BlockSpec((1, latent_dim), lambda i: (0, 0)),
                pl.BlockSpec((latent_dim, c_pad), lambda i: (0, 0)),
                pl.BlockSpec((1, c_pad), lambda i: (0, 0)),
            ],
            out_specs=pl.BlockSpec((block_b, c_pad), lambda i: (i, 0)),
        ),
        compiler_params=pltpu.CompilerParams(
            dimension_semantics=("parallel",),
        ),
    )(x_b, w1_t, b1_2d, w2_t, b2_2d)

    # Drop batch padding and the lane padding on the output columns.
    return out[:B, :num_domains]


def _init_linear(key, out_dim, in_dim):
    # Deterministic, PyTorch-like uniform init: U(-1/sqrt(in), 1/sqrt(in)).
    kw, kb = jax.random.split(key)
    bound = 1.0 / jnp.sqrt(jnp.float32(in_dim))
    w = jax.random.uniform(kw, (out_dim, in_dim), jnp.float32, -bound, bound)
    b = jax.random.uniform(kb, (out_dim,), jnp.float32, -bound, bound)
    return w, b


if __name__ == "__main__":
    # Module-consistent small shapes. batch is deliberately NOT a multiple of
    # block_b to exercise the padded last tile, and gives a 3-step parallel grid.
    batch = 300
    input_dim = 32       # feature dim fed into the predictor
    latent_dim_d = 32    # args.latent_dim_d
    num_domains = 4
    block_b = 128

    key = jax.random.PRNGKey(0)
    kx, k1, k2 = jax.random.split(key, 3)

    x = jax.random.normal(kx, (batch, input_dim), jnp.float32)
    w1, b1 = _init_linear(k1, latent_dim_d, input_dim)
    w2, b2 = _init_linear(k2, num_domains, latent_dim_d)

    params = prepare_params(w1, b1, w2, b2)
    out = domain_predictor_forward(x, *params, num_domains=num_domains,
                                   block_b=block_b)
    out = jax.block_until_ready(out)
    assert out.shape == (batch, num_domains)

    # Reference that mirrors the kernel's precision (bf16 operands, f32 accum).
    xb = x.astype(jnp.bfloat16).astype(jnp.float32)
    w1b = w1.astype(jnp.bfloat16).astype(jnp.float32)
    w2b = w2.astype(jnp.bfloat16).astype(jnp.float32)
    h = jnp.maximum(xb @ w1b.T + b1, 0.0)
    ref = h.astype(jnp.bfloat16).astype(jnp.float32) @ w2b.T + b2
    assert jnp.allclose(out, ref, atol=1e-4, rtol=1e-4), "mismatch vs reference"

    print("KERNEL_OK")
</pallas_src>

<mosaic_0001>
module attributes {stable_mosaic.version = 11 : i64} {
  func.func @_mlp_kernel(%arg0: i32, %arg1: memref<128x32xbf16, #tpu.memory_space<vmem>>, %arg2: memref<32x32xbf16, #tpu.memory_space<vmem>>, %arg3: memref<1x32xf32, #tpu.memory_space<vmem>>, %arg4: memref<32x128xbf16, #tpu.memory_space<vmem>>, %arg5: memref<1x128xf32, #tpu.memory_space<vmem>>, %arg6: memref<128x128xf32, #tpu.memory_space<vmem>>) attributes {dimension_semantics = [#tpu.dimension_semantics<parallel>], iteration_bounds = array<i64: 3>, scalar_prefetch = 0 : i64, scratch_operands = 0 : i64, tpu.core_type = #tpu.core_type<tc>, window_params = [{transform_indices = @transform_0, window_bounds = array<i64: 128, 32>}, {pipeline_mode = #tpu.pipeline_mode<synchronous>, transform_indices = @transform_1, window_bounds = array<i64: 32, 32>}, {pipeline_mode = #tpu.pipeline_mode<synchronous>, transform_indices = @transform_2, window_bounds = array<i64: 1, 32>}, {pipeline_mode = #tpu.pipeline_mode<synchronous>, transform_indices = @transform_3, window_bounds = array<i64: 32, 128>}, {pipeline_mode = #tpu.pipeline_mode<synchronous>, transform_indices = @transform_4, window_bounds = array<i64: 1, 128>}, {transform_indices = @transform_5, window_bounds = array<i64: 128, 128>}]} {
    %c0 = arith.constant 0 : index
    %c0_0 = arith.constant 0 : index
    %0 = vector.load %arg1[%c0, %c0_0] : memref<128x32xbf16, #tpu.memory_space<vmem>>, vector<128x32xbf16>
    %c0_1 = arith.constant 0 : index
    %c0_2 = arith.constant 0 : index
    %1 = vector.load %arg2[%c0_1, %c0_2] : memref<32x32xbf16, #tpu.memory_space<vmem>>, vector<32x32xbf16>
    %cst = arith.constant dense<0.000000e+00> : vector<128x32xf32>
    %2 = tpu.matmul %0, %1, %cst {dimension_numbers = #tpu.dot_dimension_numbers<[1], [0], [0], [1], [0, 0, 1, 1], [], []>} : vector<128x32xbf16>, vector<32x32xbf16>, vector<128x32xf32> -> vector<128x32xf32>
    %c0_3 = arith.constant 0 : index
    %c0_4 = arith.constant 0 : index
    %3 = vector.load %arg3[%c0_3, %c0_4] : memref<1x32xf32, #tpu.memory_space<vmem>>, vector<1x32xf32>
    %4 = vector.broadcast %3 : vector<1x32xf32> to vector<128x32xf32>
    %5 = arith.addf %2, %4 : vector<128x32xf32>
    %cst_5 = arith.constant 0.000000e+00 : f32
    %6 = vector.broadcast %cst_5 : f32 to vector<128x32xf32>
    %7 = arith.maximumf %5, %6 : vector<128x32xf32>
    %8 = arith.truncf %7 : vector<128x32xf32> to vector<128x32xbf16>
    %c0_6 = arith.constant 0 : index
    %c0_7 = arith.constant 0 : index
    %9 = vector.load %arg4[%c0_6, %c0_7] : memref<32x128xbf16, #tpu.memory_space<vmem>>, vector<32x128xbf16>
    %cst_8 = arith.constant dense<0.000000e+00> : vector<128x128xf32>
    %10 = tpu.matmul %8, %9, %cst_8 {dimension_numbers = #tpu.dot_dimension_numbers<[1], [0], [0], [1], [0, 0, 1, 1], [], []>} : vector<128x32xbf16>, vector<32x128xbf16>, vector<128x128xf32> -> vector<128x128xf32>
    %c0_9 = arith.constant 0 : index
    %c0_10 = arith.constant 0 : index
    %11 = vector.load %arg5[%c0_9, %c0_10] : memref<1x128xf32, #tpu.memory_space<vmem>>, vector<1x128xf32>
    %12 = vector.broadcast %11 : vector<1x128xf32> to vector<128x128xf32>
    %13 = arith.addf %10, %12 : vector<128x128xf32>
    %c0_11 = arith.constant 0 : index
    %c0_12 = arith.constant 0 : index
    %14 = vector.load %arg6[%c0_11, %c0_12] : memref<128x128xf32, #tpu.memory_space<vmem>>, vector<128x128xf32>
    tpu.vector_store %arg6[%c0_11, %c0_12], %13 {strides = array<i32>} : memref<128x128xf32, #tpu.memory_space<vmem>>, vector<128x128xf32>,
    return
  }
  func.func @transform_0(%arg0: i32) -> (i32, i32) {
    %c0_i32 = arith.constant 0 : i32
    %c0_i32_0 = arith.constant 0 : i32
    return %arg0, %c0_i32 : i32, i32
  }
  func.func @transform_1(%arg0: i32) -> (i32, i32) {
    %c0_i32 = arith.constant 0 : i32
    %c0_i32_0 = arith.constant 0 : i32
    %c0_i32_1 = arith.constant 0 : i32
    return %c0_i32, %c0_i32_0 : i32, i32
  }
  func.func @transform_2(%arg0: i32) -> (i32, i32) {
    %c0_i32 = arith.constant 0 : i32
    %c0_i32_0 = arith.constant 0 : i32
    %c0_i32_1 = arith.constant 0 : i32
    return %c0_i32, %c0_i32_0 : i32, i32
  }
  func.func @transform_3(%arg0: i32) -> (i32, i32) {
    %c0_i32 = arith.constant 0 : i32
    %c0_i32_0 = arith.constant 0 : i32
    %c0_i32_1 = arith.constant 0 : i32
    return %c0_i32, %c0_i32_0 : i32, i32
  }
  func.func @transform_4(%arg0: i32) -> (i32, i32) {
    %c0_i32 = arith.constant 0 : i32
    %c0_i32_0 = arith.constant 0 : i32
    %c0_i32_1 = arith.constant 0 : i32
    return %c0_i32, %c0_i32_0 : i32, i32
  }
  func.func @transform_5(%arg0: i32) -> (i32, i32) {
    %c0_i32 = arith.constant 0 : i32
    %c0_i32_0 = arith.constant 0 : i32
    return %arg0, %c0_i32 : i32, i32
  }
}

</mosaic_0001>

<bundles_post_ra>
// kernel: domain_predictor_forward.1
= control target key start
LH: loop header
LB: loop body
LE: loop exit
PB: predicated region body
PF: predicated region fallthrough
CT: control target
= control target key end

     0   :  { %s707_s18 = smov 0   ;;  %s780_s0 = inlined_call_operand.vmem [shape: bf16[384,32], index: 0, kind: input, shape index: {}]   ;;  %s781_s1 = inlined_call_operand.vmem [shape: bf16[32,32], index: 1, kind: input, shape index: {}]   ;;  %s782_s2 = inlined_call_operand.vmem [shape: f32[1,32], index: 2, kind: input, shape index: {}]   ;;  %s783_s3 = inlined_call_operand.vmem [shape: bf16[32,128], index: 3, kind: input, shape index: {}]   ;;  %s784_s4 = inlined_call_operand.vmem [shape: f32[1,128], index: 4, kind: input, shape index: {}]   ;;  %s785_s5 = inlined_call_operand.vmem [shape: f32[384,128], index: 5, kind: output, shape index: {}]  }
   0x1 LB: > { %s568_s19 = sadd.s32 4294967295, %s675_s18   ;;  %p572_p0 = scmp.ge.s32.totalorder %s675_s18, 1  ;;  %s675_s18 = sphi %s707_s18, %s15_s18  }
   0x2   : > { %p188_p1 = scmp.lt.s32.totalorder %s675_s18, 4 }
   0x4   : > { %p189_p2 = pnand %p572_p0, %p188_p1 }
   0x5   : > { %s573_s22 = sshll.u32 (!%p189_p2), %s568_s19, 4 }
   0x6   : > { %192 = sbr.rel (%p189_p2) target bundleno = 356 (0x164), region = 40  ;;  %p217_p3 = scmp.lt.s32.totalorder (!%p189_p2), %s573_s22, 47 }
   0xb   : > { %v652_v0 = vld [vmem:[%s781_s1 + $0x8] sm:$0xff]  ;;  %v651_v1 = vld [vmem:[%s781_s1] sm:$0xff]  ;;  %s787_s22 = smov (!%p217_p3, %s573_s22), 47  ;;  %vm305_vm0 = vcmask 261120  }
   0xc   : > { %336 = vmatpush.bf16.msra.mxu0 %v652_v0  ;;  %655 = vmatpush.bf16.msra.mxu2 %v652_v0  ;;  %s574_s25 = sshll.u32 %s787_s22, 2  ;;  %v654_v10 = vld [vmem:[%s783_s3 + $0x8] sm:$0xff]  ;;  %v653_v11 = vld [vmem:[%s783_s3] sm:$0xff]  ;;  %s576_s10 = sshll.u32 %s787_s22, 3 }
   0xd   : > { %s220_s28 = scalar_lea.vmem %s780_s0, %s574_s25  ;;  %453 = vmatpush.bf16.msra.mxu1 %v654_v10  ;;  %657 = vmatpush.bf16.msra.mxu3 %v654_v10  ;;  %v667_v13 = vld [vmem:[%s782_s2] ss:$0 sm:$0xff]  ;;  %s759_s15 = scalar_lea.vmem %s785_s5, %s576_s10 }
   0xe   : > { %v643_v2 = vld [vmem:[%s220_s28] sm:$0xff]  ;;  %v644_v4 = vld [vmem:[%s220_s28 + $0x8] sm:$0xff]  ;;  %v645_v6 = vld [vmem:[%s220_s28 + $0x10] sm:$0xff] }
   0xf   : > { %v647_v3 = vld [vmem:[%s220_s28 + $0x20] sm:$0xff]  ;;  %v648_v5 = vld [vmem:[%s220_s28 + $0x28] sm:$0xff]  ;;  %v649_v7 = vld [vmem:[%s220_s28 + $0x30] sm:$0xff] }
  0x10   : > { %337 = vmatpush.bf16.msra.mxu0 %v651_v1  ;;  %656 = vmatpush.bf16.msra.mxu2 %v651_v1  ;;  %v646_v8 = vld [vmem:[%s220_s28 + $0x18] sm:$0xff] }
  0x11   : > { %v650_v9 = vld [vmem:[%s220_s28 + $0x38] sm:$0xff]  ;;  %454 = vmatpush.bf16.msra.mxu1 %v653_v11  ;;  %658 = vmatpush.bf16.msra.mxu3 %v653_v11 }
  0x13   : > { %617 = vmatmul.msk.bf16.vlgmr.msra.gmra.mxu0 %vm305_vm0, %v643_v2  ;;  %621 = vmatmul.msk.bf16.vlgmr.msra.gmra.mxu2 %vm305_vm0, %v647_v3 }
  0x23   : > { %618 = vmatmul.msk.bf16.gmra.mxu0 %vm305_vm0, %v644_v4  ;;  %622 = vmatmul.msk.bf16.gmra.mxu2 %vm305_vm0, %v648_v5  ;;  %v668_v5 = vld [vmem:[%s784_s4] ss:$0 sm:$0xff] }
  0x33   : > { %619 = vmatmul.msk.bf16.gmra.mxu0 %vm305_vm0, %v645_v6  ;;  %623 = vmatmul.msk.bf16.gmra.mxu2 %vm305_vm0, %v649_v7 }
  0x43   : > { %620 = vmatmul.msk.bf16.gmra.mxu0 %vm305_vm0, %v646_v8  ;;  %624 = vmatmul.msk.bf16.gmra.mxu2 %vm305_vm0, %v650_v9 }
  0x90   : > { %v339_v12 = vpop.f32.mrf.mxu0 }
  0x91   : > { %v340_v14 = vadd.f32 %v667_v13, %v339_v12 }
  0x93   : > { %v379_v17 = vmax.f32 %v340_v14, 0.0 }
  0x96   : > { %v359_v15 = vpop.f32.mrf.mxu2 }
  0x97   : > { %v360_v20 = vadd.f32 %v667_v13, %v359_v15 }
  0x98   : > { %v341_v16 = vpop.f32.mrf.mxu0 }
  0x99   : > { %v342_v18 = vadd.f32 %v667_v13, %v341_v16  ;;  %v387_v25 = vmax.f32 %v360_v20, 0.0 }
  0x9b   : > { %v380_v19 = vmax.f32 %v342_v18, 0.0 }
  0x9d   : > { %v395_v21 = vpack.c.bf16 %v380_v19, %v379_v17 }
  0x9e   : > { %v361_v22 = vpop.f32.mrf.mxu2 }
  0x9f   : > { %v362_v23 = vadd.f32 %v667_v13, %v361_v22  ;;  %633 = vmatmul.msk.bf16.vlgmr.msra.gmra.mxu1 %vm305_vm0, %v395_v21 }
  0xa0   : > { %v344_v24 = vpop.f32.mrf.mxu0 }
  0xa1   : > { %v388_v26 = vmax.f32 %v362_v23, 0.0  ;;  %v345_v28 = vadd.f32 %v667_v13, %v344_v24 }
  0xa3   : > { %v399_v27 = vpack.c.bf16 %v388_v26, %v387_v25  ;;  %v381_v31 = vmax.f32 %v345_v28, 0.0 }
  0xa5   : > { %637 = vmatmul.msk.bf16.vlgmr.msra.gmra.mxu3 %vm305_vm0, %v399_v27 }
  0xa6   : > { %v364_v29 = vpop.f32.mrf.mxu2 }
  0xa7   : > { %v365_v34 = vadd.f32 %v667_v13, %v364_v29 }
  0xa8   : > { %v346_v30 = vpop.f32.mrf.mxu0 }
  0xa9   : > { %v347_v32 = vadd.f32 %v667_v13, %v346_v30  ;;  %v389_v39 = vmax.f32 %v365_v34, 0.0 }
  0xab   : > { %v382_v33 = vmax.f32 %v347_v32, 0.0 }
  0xad   : > { %v396_v35 = vpack.c.bf16 %v382_v33, %v381_v31 }
  0xae   : > { %v366_v36 = vpop.f32.mrf.mxu2 }
  0xaf   : > { %v367_v37 = vadd.f32 %v667_v13, %v366_v36  ;;  %634 = vmatmul.msk.bf16.gmra.mxu1 %vm305_vm0, %v396_v35 }
  0xb0   : > { %v349_v38 = vpop.f32.mrf.mxu0 }
  0xb1   : > { %v390_v40 = vmax.f32 %v367_v37, 0.0  ;;  %v350_v42 = vadd.f32 %v667_v13, %v349_v38 }
  0xb3   : > { %v400_v41 = vpack.c.bf16 %v390_v40, %v389_v39  ;;  %v383_v45 = vmax.f32 %v350_v42, 0.0 }
  0xb5   : > { %638 = vmatmul.msk.bf16.gmra.mxu3 %vm305_vm0, %v400_v41 }
  0xb6   : > { %v369_v43 = vpop.f32.mrf.mxu2 }
  0xb7   : > { %v370_v48 = vadd.f32 %v667_v13, %v369_v43 }
  0xb8   : > { %v351_v44 = vpop.f32.mrf.mxu0 }
  0xb9   : > { %v352_v46 = vadd.f32 %v667_v13, %v351_v44  ;;  %v391_v53 = vmax.f32 %v370_v48, 0.0 }
  0xbb   : > { %v384_v47 = vmax.f32 %v352_v46, 0.0 }
  0xbd   : > { %v397_v49 = vpack.c.bf16 %v384_v47, %v383_v45 }
  0xbe   : > { %v371_v50 = vpop.f32.mrf.mxu2 }
  0xbf   : > { %v372_v51 = vadd.f32 %v667_v13, %v371_v50  ;;  %635 = vmatmul.msk.bf16.gmra.mxu1 %vm305_vm0, %v397_v49 }
  0xc0   : > { %v354_v52 = vpop.f32.mrf.mxu0 }
  0xc1   : > { %v392_v54 = vmax.f32 %v372_v51, 0.0  ;;  %v355_v56 = vadd.f32 %v667_v13, %v354_v52 }
  0xc3   : > { %v401_v55 = vpack.c.bf16 %v392_v54, %v391_v53  ;;  %v385_v59 = vmax.f32 %v355_v56, 0.0 }
  0xc5   : > { %639 = vmatmul.msk.bf16.gmra.mxu3 %vm305_vm0, %v401_v55 }
  0xc6   : > { %v374_v57 = vpop.f32.mrf.mxu2 }
  0xc7   : > { %v375_v62 = vadd.f32 %v667_v13, %v374_v57 }
  0xc8   : > { %v356_v58 = vpop.f32.mrf.mxu0 }
  0xc9   : > { %v357_v60 = vadd.f32 %v667_v13, %v356_v58  ;;  %v393_v2 = vmax.f32 %v375_v62, 0.0 }
  0xcb   : > { %v386_v61 = vmax.f32 %v357_v60, 0.0 }
  0xcd   : > { %v398_v63 = vpack.c.bf16 %v386_v61, %v385_v59 }
  0xce   : > { %v376_v0 = vpop.f32.mrf.mxu2 }
  0xcf   : > { %v377_v1 = vadd.f32 %v667_v13, %v376_v0  ;;  %636 = vmatmul.msk.bf16.gmra.mxu1 %vm305_vm0, %v398_v63 }
  0xd1   : > { %v394_v3 = vmax.f32 %v377_v1, 0.0 }
  0xd3   : > { %v402_v4 = vpack.c.bf16 %v394_v3, %v393_v2 }
  0xd5   : > { %640 = vmatmul.msk.bf16.gmra.mxu3 %vm305_vm0, %v402_v4 }
 0x11c   : > { %v456_v6 = vpop.f32.mrf.mxu1 }
 0x11d   : > { %v457_v7 = vadd.f32 %v668_v5, %v456_v6 }
 0x11f   : > { %496 = vst [vmem:[%s759_s15] sm:$0xff] %v457_v7 }
 0x124   : > { %v458_v8 = vpop.f32.mrf.mxu1 }
 0x125   : > { %v459_v9 = vadd.f32 %v668_v5, %v458_v8 }
 0x127   : > { %497 = vst [vmem:[%s759_s15 + $0x8] sm:$0xff] %v459_v9 }
 0x128   : > { %v476_v10 = vpop.f32.mrf.mxu3 }
 0x129   : > { %v477_v11 = vadd.f32 %v668_v5, %v476_v10 }
 0x12b   : > { %504 = vst [vmem:[%s759_s15 + $0x40] sm:$0xff] %v477_v11 }
 0x12c   : > { %v461_v12 = vpop.f32.mrf.mxu1 }
 0x12d   : > { %v462_v13 = vadd.f32 %v668_v5, %v461_v12 }
 0x12f   : > { %498 = vst [vmem:[%s759_s15 + $0x10] sm:$0xff] %v462_v13 }
 0x130   : > { %v478_v14 = vpop.f32.mrf.mxu3 }
 0x131   : > { %v479_v15 = vadd.f32 %v668_v5, %v478_v14 }
 0x133   : > { %505 = vst [vmem:[%s759_s15 + $0x48] sm:$0xff] %v479_v15 }
 0x134   : > { %v463_v16 = vpop.f32.mrf.mxu1 }
 0x135   : > { %v464_v17 = vadd.f32 %v668_v5, %v463_v16 }
 0x137   : > { %499 = vst [vmem:[%s759_s15 + $0x18] sm:$0xff] %v464_v17 }
 0x138   : > { %v481_v18 = vpop.f32.mrf.mxu3 }
 0x139   : > { %v482_v19 = vadd.f32 %v668_v5, %v481_v18 }
 0x13b   : > { %506 = vst [vmem:[%s759_s15 + $0x50] sm:$0xff] %v482_v19 }
 0x13c   : > { %v466_v20 = vpop.f32.mrf.mxu1 }
 0x13d   : > { %v467_v21 = vadd.f32 %v668_v5, %v466_v20 }
 0x13f   : > { %500 = vst [vmem:[%s759_s15 + $0x20] sm:$0xff] %v467_v21 }
 0x140   : > { %v483_v22 = vpop.f32.mrf.mxu3 }
 0x141   : > { %v484_v23 = vadd.f32 %v668_v5, %v483_v22 }
 0x143   : > { %507 = vst [vmem:[%s759_s15 + $0x58] sm:$0xff] %v484_v23 }
 0x144   : > { %v468_v24 = vpop.f32.mrf.mxu1 }
 0x145   : > { %v469_v25 = vadd.f32 %v668_v5, %v468_v24 }
 0x147   : > { %501 = vst [vmem:[%s759_s15 + $0x28] sm:$0xff] %v469_v25 }
 0x148   : > { %v486_v26 = vpop.f32.mrf.mxu3 }
 0x149   : > { %v487_v27 = vadd.f32 %v668_v5, %v486_v26 }
 0x14b   : > { %508 = vst [vmem:[%s759_s15 + $0x60] sm:$0xff] %v487_v27 }
 0x14c   : > { %v471_v28 = vpop.f32.mrf.mxu1 }
 0x14d   : > { %v472_v29 = vadd.f32 %v668_v5, %v471_v28 }
 0x14f   : > { %502 = vst [vmem:[%s759_s15 + $0x30] sm:$0xff] %v472_v29 }
 0x150   : > { %v488_v30 = vpop.f32.mrf.mxu3 }
 0x151   : > { %v489_v31 = vadd.f32 %v668_v5, %v488_v30 }
 0x153   : > { %509 = vst [vmem:[%s759_s15 + $0x68] sm:$0xff] %v489_v31 }
 0x154   : > { %v473_v32 = vpop.f32.mrf.mxu1 }
 0x155   : > { %v474_v33 = vadd.f32 %v668_v5, %v473_v32 }
 0x157   : > { %503 = vst [vmem:[%s759_s15 + $0x38] sm:$0xff] %v474_v33 }
 0x158   : > { %v491_v34 = vpop.f32.mrf.mxu3 }
 0x159   : > { %v492_v35 = vadd.f32 %v668_v5, %v491_v34 }
 0x15b   : > { %510 = vst [vmem:[%s759_s15 + $0x70] sm:$0xff] %v492_v35 }
 0x160   : > { %v493_v36 = vpop.f32.mrf.mxu3 }
 0x161   : > { %v494_v37 = vadd.f32 %v668_v5, %v493_v36 }
 0x163   : > { %511 = vst [vmem:[%s759_s15 + $0x78] sm:$0xff] %v494_v37 }
 0x164 PF: > { %s15_s18 = sadd.s32 1, %s675_s18  }
 0x165   : > { %p12_p4 = scmp.ge.s32.totalorder %s15_s18, 5  }
 0x167   :  { %14 = sbr.rel (!%p12_p4) target bundleno = 1 (0x1), region = 70 }

</bundles_post_ra>
